<compile_context>
chip_gen: v7x
topology: tpu7x:2x2x1
jax: 0.10.0
libtpu: 0.0.40
codegen_flags: <defaults>
</compile_context>

<pallas_src>
import functools
import math

import jax
import jax.numpy as jnp
from jax import lax
from jax.experimental import pallas as pl
from jax.experimental.pallas import tpu as pltpu


def _tile(n, preferred):
    """Largest preferred tile that divides n, else n itself (small shapes)."""
    for t in preferred:
        if n % t == 0:
            return t
    return n


def _heads_per_block(num_heads, head_dim):
    """Heads processed per kernel-2 grid step.

    Chosen so the lane block G*head_dim is a multiple of 128 (lane-dense vregs,
    unmasked stores) or covers the full hidden dim, which also satisfies the
    (8,128) BlockSpec divisibility rule.
    """
    if head_dim <= 128 and 128 % head_dim == 0 and num_heads % (128 // head_dim) == 0:
        return 128 // head_dim
    if head_dim % 128 == 0:
        return 1
    return num_heads


# --------------------------------------------------------------------------- #
# Kernel 1: fused Q/K/V projection with a single packed (D, 3D) weight.
# --------------------------------------------------------------------------- #
def _qkv_proj_kernel(x_ref, w_ref, b_ref, q_ref, k_ref, v_ref, *, hidden_dim):
    D = hidden_dim
    x = x_ref[0].astype(w_ref.dtype)                       # (TQ, D) -> compute dtype
    y = jnp.dot(x, w_ref[...], preferred_element_type=jnp.float32) + b_ref[...]
    # 1/sqrt(head_dim) is already folded into the Q columns of w/b.
    q_ref[0] = y[:, :D].astype(q_ref.dtype)
    k_ref[0] = y[:, D:2 * D].astype(k_ref.dtype)
    v_ref[0] = y[:, 2 * D:].astype(v_ref.dtype)


# --------------------------------------------------------------------------- #
# Kernel 2: flash-style attention.  K/V resident per (batch, head-group),
# G heads per step read/written as one contiguous lane block of (B, S, D).
# --------------------------------------------------------------------------- #
def _attention_kernel(q_ref, k_ref, v_ref, mask_ref, o_ref,
                      m_sc, l_sc, acc_sc,
                      *, heads_per_block, head_dim, tk, approx_recip):
    j = pl.program_id(3)

    @pl.when(j == 0)
    def _init():
        m_sc[...] = jnp.full(m_sc.shape, -jnp.inf, dtype=m_sc.dtype)
        l_sc[...] = jnp.zeros(l_sc.shape, dtype=l_sc.dtype)
        acc_sc[...] = jnp.zeros(acc_sc.shape, dtype=acc_sc.dtype)

    off = pl.multiple_of(j * tk, tk)
    q_blk = q_ref[0]                                  # (TQ, G*hd)  (already scaled)
    k_blk = k_ref[0, pl.ds(off, tk), :]               # (TK, G*hd)  slice of resident K
    v_blk = v_ref[0, pl.ds(off, tk), :]               # (TK, G*hd)  slice of resident V
    mask_blk = mask_ref[0]                            # (1, TK)     additive f32 mask

    for g in range(heads_per_block):                  # static, unrolled per-head loop
        lo = g * head_dim
        hi = lo + head_dim
        qg = q_blk[:, lo:hi]                          # (TQ, hd)
        kg = k_blk[:, lo:hi]                          # (TK, hd)
        vg = v_blk[:, lo:hi]                          # (TK, hd)

        # q @ k^T without materializing a transpose (contract dim 1 of both).
        s = lax.dot_general(qg, kg, (((1,), (1,)), ((), ())),
                            preferred_element_type=jnp.float32)      # (TQ, TK)
        s = s + mask_blk

        m_prev = m_sc[g]                              # (TQ, 1)
        m_new = jnp.maximum(m_prev, jnp.max(s, axis=-1, keepdims=True))
        alpha = jnp.exp(m_prev - m_new)
        p = jnp.exp(s - m_new)                        # (TQ, TK) f32
        l_sc[g] = alpha * l_sc[g] + jnp.sum(p, axis=-1, keepdims=True)
        acc_sc[g] = alpha * acc_sc[g] + jnp.dot(
            p.astype(vg.dtype), vg, preferred_element_type=jnp.float32)
        m_sc[g] = m_new

    @pl.when(j == pl.num_programs(3) - 1)
    def _finalize():
        parts = []
        for g in range(heads_per_block):
            inv_l = pl.reciprocal(l_sc[g], approx=approx_recip)
            parts.append(acc_sc[g] * inv_l)
        out = parts[0] if heads_per_block == 1 else jnp.concatenate(parts, axis=-1)
        o_ref[0] = out.astype(o_ref.dtype)            # one lane-dense (TQ, G*hd) store


# --------------------------------------------------------------------------- #
# Wrapper.
# --------------------------------------------------------------------------- #
def multi_head_attention(x, wq, bq, wk, bk, wv, bv, key_mask, *, num_heads,
                         compute_dtype=jnp.bfloat16, vmem_limit_bytes=None):
    """MHA forward (dropout = identity, inference semantics).

    x:        (B, S, D) activations.
    wq/wk/wv: (D, D) weights in (in, out) layout (= torch weight.T).
    bq/bk/bv: (1, D) biases.
    key_mask: (B, S); 0 => key masked out (same semantics as the torch module's
              (B, H, S, S) expanded mask, passed un-expanded).
    compute_dtype: MXU input dtype (bfloat16 for production; float32 for exact
              comparison).  Accumulation / softmax state is always float32.
    Returns:  (B, S, D) in x.dtype.
    """
    B, S, D = x.shape
    H = num_heads
    assert D % H == 0, "hidden_dim must be divisible by num_heads"
    hd = D // H
    scale = 1.0 / math.sqrt(hd)

    G = _heads_per_block(H, hd)       # heads per kernel-2 grid step
    n_hg = H // G                     # head-group grid extent
    GH = G * hd                       # lane width of every kernel-2 block
    TQ = _tile(S, (256, 512, 128))
    TK = _tile(S, (256, 128))         # capped so the score tile stays in vregs
    n_q = S // TQ
    n_k = S // TK

    # Packed (D, 3D) weight / (1, 3D) bias; fold 1/sqrt(hd) into the Q columns.
    # Weights cast to compute_dtype (bf16 in production): half the resident
    # VMEM and the MXU's native input dtype.
    w_packed = jnp.concatenate([wq * scale, wk, wv], axis=1).astype(compute_dtype)
    b_packed = jnp.concatenate([bq * scale, bk, bv], axis=1).astype(jnp.float32)

    # ---- Kernel 1: fused QKV projection -------------------------------------
    q, k, v = pl.pallas_call(
        functools.partial(_qkv_proj_kernel, hidden_dim=D),
        out_shape=[jax.ShapeDtypeStruct((B, S, D), compute_dtype) for _ in range(3)],
        grid_spec=pltpu.PrefetchScalarGridSpec(
            num_scalar_prefetch=0,
            grid=(B, n_q),
            in_specs=[
                pl.BlockSpec((1, TQ, D), lambda b, i: (b, i, 0)),    # x
                pl.BlockSpec((D, 3 * D), lambda b, i: (0, 0)),       # packed W (resident)
                pl.BlockSpec((1, 3 * D), lambda b, i: (0, 0)),       # packed bias
            ],
            out_specs=[pl.BlockSpec((1, TQ, D), lambda b, i: (b, i, 0))
                       for _ in range(3)],
        ),
        compiler_params=pltpu.CompilerParams(
            dimension_semantics=("parallel", "parallel"),
            vmem_limit_bytes=vmem_limit_bytes),
    )(x, w_packed, b_packed)

    # Additive key mask (0 keep / -1e9 masked): (B, 1, S) float32 instead of a
    # pre-expanded (B, H, S, S) mask.
    amask = jnp.where(key_mask == 0, jnp.float32(-1e9), jnp.float32(0.0))[:, None, :]

    # ---- Kernel 2: flash-style attention, no head-split transposes ----------
    out = pl.pallas_call(
        functools.partial(_attention_kernel, heads_per_block=G, head_dim=hd,
                          tk=TK, approx_recip=(compute_dtype != jnp.float32)),
        out_shape=jax.ShapeDtypeStruct((B, S, D), x.dtype),
        grid_spec=pltpu.PrefetchScalarGridSpec(
            num_scalar_prefetch=0,
            grid=(B, n_hg, n_q, n_k),
            in_specs=[
                pl.BlockSpec((1, TQ, GH), lambda b, h, i, j: (b, i, h)),  # Q tile
                pl.BlockSpec((1, S, GH), lambda b, h, i, j: (b, 0, h)),   # K resident
                pl.BlockSpec((1, S, GH), lambda b, h, i, j: (b, 0, h)),   # V resident
                pl.BlockSpec((1, 1, TK), lambda b, h, i, j: (b, 0, j)),   # mask tile
            ],
            out_specs=pl.BlockSpec((1, TQ, GH), lambda b, h, i, j: (b, i, h)),
            scratch_shapes=[
                pltpu.VMEM((G, TQ, 1), jnp.float32),    # running row max per head
                pltpu.VMEM((G, TQ, 1), jnp.float32),    # running row sum per head
                pltpu.VMEM((G, TQ, hd), jnp.float32),   # output accumulator per head
            ],
        ),
        compiler_params=pltpu.CompilerParams(
            dimension_semantics=("parallel", "parallel", "parallel", "arbitrary"),
            vmem_limit_bytes=vmem_limit_bytes),
    )(q, k, v, amask)

    return out


# --------------------------------------------------------------------------- #
# Pure-JAX reference mirroring the PyTorch forward (dropout = identity).
# --------------------------------------------------------------------------- #
def reference_mha(x, wq, bq, wk, bk, wv, bv, key_mask, num_heads):
    B, S, D = x.shape
    H, hd = num_heads, D // num_heads
    q = x @ wq + bq
    k = x @ wk + bk
    v = x @ wv + bv
    qh = q.reshape(B, S, H, hd).transpose(0, 2, 1, 3)
    kh = k.reshape(B, S, H, hd).transpose(0, 2, 1, 3)
    vh = v.reshape(B, S, H, hd).transpose(0, 2, 1, 3)
    att = jnp.einsum("bhqd,bhkd->bhqk", qh, kh) / math.sqrt(hd)
    mask4 = jnp.broadcast_to(key_mask[:, None, None, :], (B, H, S, S))
    att = jnp.where(mask4 == 0, -1000000000.0, att)
    p = jax.nn.softmax(att, axis=-1)
    o = jnp.einsum("bhqk,bhkd->bhqd", p, vh)
    return o.transpose(0, 2, 1, 3).reshape(B, S, D)


if __name__ == "__main__":
    # Small shapes consistent with the module's forward: (batch, seq, hidden).
    B, S, D, H = 2, 8, 32, 4

    key = jax.random.PRNGKey(0)
    k_x, k_wq, k_bq, k_wk, k_bk, k_wv, k_bv, k_m = jax.random.split(key, 8)

    x = jax.random.uniform(k_x, (B, S, D), dtype=jnp.float32)

    # nn.Linear-style init: U(-1/sqrt(D), 1/sqrt(D)); weights stored (in, out).
    bound = 1.0 / math.sqrt(D)
    init = lambda k, shape: jax.random.uniform(k, shape, jnp.float32, -bound, bound)
    wq, bq = init(k_wq, (D, D)), init(k_bq, (1, D))
    wk, bk = init(k_wk, (D, D)), init(k_bk, (1, D))
    wv, bv = init(k_wv, (D, D)), init(k_bv, (1, D))

    # Raw (B, S) key mask — what the torch snippet expands to (B, H, S, S).
    key_mask = (jax.random.uniform(k_m, (B, S)) > 0.3).astype(jnp.int32)
    key_mask = key_mask.at[:, 0].set(1)   # keep at least one valid key per batch

    ref = reference_mha(x, wq, bq, wk, bk, wv, bv, key_mask, H)

    fn = jax.jit(multi_head_attention,
                 static_argnames=("num_heads", "compute_dtype"))

    # Full-precision path: tight check against the f32 reference.
    out_f32 = jax.block_until_ready(
        fn(x, wq, bq, wk, bk, wv, bv, key_mask, num_heads=H,
           compute_dtype=jnp.float32))
    assert out_f32.shape == (B, S, D)
    err_f32 = float(jnp.max(jnp.abs(out_f32 - ref)))
    assert jnp.allclose(out_f32, ref, atol=2e-3, rtol=2e-3), \
        f"f32 mismatch vs reference: {err_f32}"

    # Production path (bf16 MXU inputs, f32 accumulation): looser tolerance.
    out_bf16 = jax.block_until_ready(
        fn(x, wq, bq, wk, bk, wv, bv, key_mask, num_heads=H,
           compute_dtype=jnp.bfloat16))
    assert out_bf16.shape == (B, S, D)
    err_bf16 = float(jnp.max(jnp.abs(out_bf16 - ref)))
    assert jnp.allclose(out_bf16, ref, atol=6e-2, rtol=6e-2), \
        f"bf16 mismatch vs reference: {err_bf16}"

    print("KERNEL_OK")
</pallas_src>

<mosaic_0001>
module attributes {stable_mosaic.version = 11 : i64} {
  func.func @_qkv_proj_kernel(%arg0: i32, %arg1: i32, %arg2: memref<1x8x32xf32, #tpu.memory_space<vmem>>, %arg3: memref<32x96xf32, #tpu.memory_space<vmem>>, %arg4: memref<1x96xf32, #tpu.memory_space<vmem>>, %arg5: memref<1x8x32xf32, #tpu.memory_space<vmem>>, %arg6: memref<1x8x32xf32, #tpu.memory_space<vmem>>, %arg7: memref<1x8x32xf32, #tpu.memory_space<vmem>>) attributes {dimension_semantics = [#tpu.dimension_semantics<parallel>, #tpu.dimension_semantics<parallel>], iteration_bounds = array<i64: 2, 1>, scalar_prefetch = 0 : i64, scratch_operands = 0 : i64, tpu.core_type = #tpu.core_type<tc>, window_params = [{transform_indices = @transform_0, window_bounds = array<i64: 1, 8, 32>}, {pipeline_mode = #tpu.pipeline_mode<synchronous>, transform_indices = @transform_1, window_bounds = array<i64: 32, 96>}, {pipeline_mode = #tpu.pipeline_mode<synchronous>, transform_indices = @transform_2, window_bounds = array<i64: 1, 96>}, {transform_indices = @transform_3, window_bounds = array<i64: 1, 8, 32>}, {transform_indices = @transform_4, window_bounds = array<i64: 1, 8, 32>}, {transform_indices = @transform_5, window_bounds = array<i64: 1, 8, 32>}]} {
    %c0 = arith.constant 0 : index
    %c0_0 = arith.constant 0 : index
    %c0_1 = arith.constant 0 : index
    %0 = vector.load %arg2[%c0, %c0_0, %c0_1] : memref<1x8x32xf32, #tpu.memory_space<vmem>>, vector<1x8x32xf32>
    %1 = vector.shape_cast %0 : vector<1x8x32xf32> to vector<8x32xf32>
    %c0_2 = arith.constant 0 : index
    %c0_3 = arith.constant 0 : index
    %2 = vector.load %arg3[%c0_2, %c0_3] : memref<32x96xf32, #tpu.memory_space<vmem>>, vector<32x96xf32>
    %cst = arith.constant dense<0.000000e+00> : vector<8x96xf32>
    %3 = tpu.matmul %1, %2, %cst {dimension_numbers = #tpu.dot_dimension_numbers<[1], [0], [0], [1], [0, 0, 1, 1], [], []>} : vector<8x32xf32>, vector<32x96xf32>, vector<8x96xf32> -> vector<8x96xf32>
    %c0_4 = arith.constant 0 : index
    %c0_5 = arith.constant 0 : index
    %4 = vector.load %arg4[%c0_4, %c0_5] : memref<1x96xf32, #tpu.memory_space<vmem>>, vector<1x96xf32>
    %5 = vector.broadcast %4 : vector<1x96xf32> to vector<8x96xf32>
    %6 = arith.addf %3, %5 : vector<8x96xf32>
    %7 = vector.extract_strided_slice %6 {offsets = [0, 0], sizes = [8, 32], strides = [1, 1]} : vector<8x96xf32> to vector<8x32xf32>
    %c0_6 = arith.constant 0 : index
    %c0_7 = arith.constant 0 : index
    %c0_8 = arith.constant 0 : index
    %8 = vector.load %arg5[%c0_6, %c0_7, %c0_8] : memref<1x8x32xf32, #tpu.memory_space<vmem>>, vector<1x8x32xf32>
    %9 = vector.shape_cast %8 : vector<1x8x32xf32> to vector<8x32xf32>
    %10 = vector.shape_cast %7 : vector<8x32xf32> to vector<1x8x32xf32>
    tpu.vector_store %arg5[%c0_6, %c0_7, %c0_8], %10 {strides = array<i32>} : memref<1x8x32xf32, #tpu.memory_space<vmem>>, vector<1x8x32xf32>,
    %11 = vector.extract_strided_slice %6 {offsets = [0, 32], sizes = [8, 32], strides = [1, 1]} : vector<8x96xf32> to vector<8x32xf32>
    %c0_9 = arith.constant 0 : index
    %c0_10 = arith.constant 0 : index
    %c0_11 = arith.constant 0 : index
    %12 = vector.load %arg6[%c0_9, %c0_10, %c0_11] : memref<1x8x32xf32, #tpu.memory_space<vmem>>, vector<1x8x32xf32>
    %13 = vector.shape_cast %12 : vector<1x8x32xf32> to vector<8x32xf32>
    %14 = vector.shape_cast %11 : vector<8x32xf32> to vector<1x8x32xf32>
    tpu.vector_store %arg6[%c0_9, %c0_10, %c0_11], %14 {strides = array<i32>} : memref<1x8x32xf32, #tpu.memory_space<vmem>>, vector<1x8x32xf32>,
    %15 = vector.extract_strided_slice %6 {offsets = [0, 64], sizes = [8, 32], strides = [1, 1]} : vector<8x96xf32> to vector<8x32xf32>
    %c0_12 = arith.constant 0 : index
    %c0_13 = arith.constant 0 : index
    %c0_14 = arith.constant 0 : index
    %16 = vector.load %arg7[%c0_12, %c0_13, %c0_14] : memref<1x8x32xf32, #tpu.memory_space<vmem>>, vector<1x8x32xf32>
    %17 = vector.shape_cast %16 : vector<1x8x32xf32> to vector<8x32xf32>
    %18 = vector.shape_cast %15 : vector<8x32xf32> to vector<1x8x32xf32>
    tpu.vector_store %arg7[%c0_12, %c0_13, %c0_14], %18 {strides = array<i32>} : memref<1x8x32xf32, #tpu.memory_space<vmem>>, vector<1x8x32xf32>,
    return
  }
  func.func @transform_0(%arg0: i32, %arg1: i32) -> (i32, i32, i32) {
    %c0_i32 = arith.constant 0 : i32
    %c0_i32_0 = arith.constant 0 : i32
    return %arg0, %arg1, %c0_i32 : i32, i32, i32
  }
  func.func @transform_1(%arg0: i32, %arg1: i32) -> (i32, i32) {
    %c0_i32 = arith.constant 0 : i32
    %c0_i32_0 = arith.constant 0 : i32
    %c0_i32_1 = arith.constant 0 : i32
    return %c0_i32, %c0_i32_0 : i32, i32
  }
  func.func @transform_2(%arg0: i32, %arg1: i32) -> (i32, i32) {
    %c0_i32 = arith.constant 0 : i32
    %c0_i32_0 = arith.constant 0 : i32
    %c0_i32_1 = arith.constant 0 : i32
    return %c0_i32, %c0_i32_0 : i32, i32
  }
  func.func @transform_3(%arg0: i32, %arg1: i32) -> (i32, i32, i32) {
    %c0_i32 = arith.constant 0 : i32
    %c0_i32_0 = arith.constant 0 : i32
    return %arg0, %arg1, %c0_i32 : i32, i32, i32
  }
  func.func @transform_4(%arg0: i32, %arg1: i32) -> (i32, i32, i32) {
    %c0_i32 = arith.constant 0 : i32
    %c0_i32_0 = arith.constant 0 : i32
    return %arg0, %arg1, %c0_i32 : i32, i32, i32
  }
  func.func @transform_5(%arg0: i32, %arg1: i32) -> (i32, i32, i32) {
    %c0_i32 = arith.constant 0 : i32
    %c0_i32_0 = arith.constant 0 : i32
    return %arg0, %arg1, %c0_i32 : i32, i32, i32
  }
}

module attributes {stable_mosaic.version = 11 : i64} {
  func.func @_attention_kernel(%arg0: i32, %arg1: i32, %arg2: i32, %arg3: i32, %arg4: memref<1x8x32xf32, #tpu.memory_space<vmem>>, %arg5: memref<1x8x32xf32, #tpu.memory_space<vmem>>, %arg6: memref<1x8x32xf32, #tpu.memory_space<vmem>>, %arg7: memref<1x1x8xf32, #tpu.memory_space<vmem>>, %arg8: memref<1x8x32xf32, #tpu.memory_space<vmem>>, %arg9: memref<4x8x1xf32, #tpu.memory_space<vmem>>, %arg10: memref<4x8x1xf32, #tpu.memory_space<vmem>>, %arg11: memref<4x8x8xf32, #tpu.memory_space<vmem>>) attributes {dimension_semantics = [#tpu.dimension_semantics<parallel>, #tpu.dimension_semantics<parallel>, #tpu.dimension_semantics<parallel>, #tpu.dimension_semantics<arbitrary>], iteration_bounds = array<i64: 2, 1, 1, 1>, scalar_prefetch = 0 : i64, scratch_operands = 3 : i64, tpu.core_type = #tpu.core_type<tc>, window_params = [{transform_indices = @transform_0, window_bounds = array<i64: 1, 8, 32>}, {transform_indices = @transform_1, window_bounds = array<i64: 1, 8, 32>}, {transform_indices = @transform_2, window_bounds = array<i64: 1, 8, 32>}, {transform_indices = @transform_3, window_bounds = array<i64: 1, 1, 8>}, {transform_indices = @transform_4, window_bounds = array<i64: 1, 8, 32>}]} {
    %c0_i32 = arith.constant 0 : i32
    %0 = arith.cmpi eq, %arg3, %c0_i32 : i32
    %1 = arith.extui %0 : i1 to i32
    %c0_i32_0 = arith.constant 0 : i32
    %2 = arith.cmpi ne, %1, %c0_i32_0 : i32
    scf.if %2 {
      %cst_96 = arith.constant 0xFF800000 : f32
      %166 = vector.broadcast %cst_96 : f32 to vector<4x8x1xf32>
      %c0_97 = arith.constant 0 : index
      %c0_98 = arith.constant 0 : index
      %c0_99 = arith.constant 0 : index
      %167 = vector.load %arg9[%c0_97, %c0_98, %c0_99] : memref<4x8x1xf32, #tpu.memory_space<vmem>>, vector<4x8x1xf32>
      tpu.vector_store %arg9[%c0_97, %c0_98, %c0_99], %166 {strides = array<i32>} : memref<4x8x1xf32, #tpu.memory_space<vmem>>, vector<4x8x1xf32>,
      %cst_100 = arith.constant 0.000000e+00 : f32
      %168 = vector.broadcast %cst_100 : f32 to vector<4x8x1xf32>
      %c0_101 = arith.constant 0 : index
      %c0_102 = arith.constant 0 : index
      %c0_103 = arith.constant 0 : index
      %169 = vector.load %arg10[%c0_101, %c0_102, %c0_103] : memref<4x8x1xf32, #tpu.memory_space<vmem>>, vector<4x8x1xf32>
      tpu.vector_store %arg10[%c0_101, %c0_102, %c0_103], %168 {strides = array<i32>} : memref<4x8x1xf32, #tpu.memory_space<vmem>>, vector<4x8x1xf32>,
      %cst_104 = arith.constant 0.000000e+00 : f32
      %170 = vector.broadcast %cst_104 : f32 to vector<4x8x8xf32>
      %c0_105 = arith.constant 0 : index
      %c0_106 = arith.constant 0 : index
      %c0_107 = arith.constant 0 : index
      %171 = vector.load %arg11[%c0_105, %c0_106, %c0_107] : memref<4x8x8xf32, #tpu.memory_space<vmem>>, vector<4x8x8xf32>
      tpu.vector_store %arg11[%c0_105, %c0_106, %c0_107], %170 {strides = array<i32>} : memref<4x8x8xf32, #tpu.memory_space<vmem>>, vector<4x8x8xf32>,
    } else {
    }
    %c8_i32 = arith.constant 8 : i32
    %3 = arith.muli %arg3, %c8_i32 : i32
    %4 = tpu.assume_multiple %3, 8 : i32
    %c0 = arith.constant 0 : index
    %c0_1 = arith.constant 0 : index
    %c0_2 = arith.constant 0 : index
    %5 = vector.load %arg4[%c0, %c0_1, %c0_2] : memref<1x8x32xf32, #tpu.memory_space<vmem>>, vector<1x8x32xf32>
    %6 = vector.shape_cast %5 : vector<1x8x32xf32> to vector<8x32xf32>
    %c0_3 = arith.constant 0 : index
    %7 = arith.index_cast %4 : i32 to index
    %c0_4 = arith.constant 0 : index
    %8 = vector.load %arg5[%c0_3, %7, %c0_4] : memref<1x8x32xf32, #tpu.memory_space<vmem>>, vector<1x8x32xf32>
    %9 = vector.shape_cast %8 : vector<1x8x32xf32> to vector<8x32xf32>
    %c0_5 = arith.constant 0 : index
    %10 = arith.index_cast %4 : i32 to index
    %c0_6 = arith.constant 0 : index
    %11 = vector.load %arg6[%c0_5, %10, %c0_6] : memref<1x8x32xf32, #tpu.memory_space<vmem>>, vector<1x8x32xf32>
    %12 = vector.shape_cast %11 : vector<1x8x32xf32> to vector<8x32xf32>
    %c0_7 = arith.constant 0 : index
    %c0_8 = arith.constant 0 : index
    %c0_9 = arith.constant 0 : index
    %13 = vector.load %arg7[%c0_7, %c0_8, %c0_9] : memref<1x1x8xf32, #tpu.memory_space<vmem>>, vector<1x1x8xf32>
    %14 = vector.shape_cast %13 : vector<1x1x8xf32> to vector<1x8xf32>
    %15 = vector.extract_strided_slice %6 {offsets = [0, 0], sizes = [8, 8], strides = [1, 1]} : vector<8x32xf32> to vector<8x8xf32>
    %16 = vector.extract_strided_slice %9 {offsets = [0, 0], sizes = [8, 8], strides = [1, 1]} : vector<8x32xf32> to vector<8x8xf32>
    %17 = vector.extract_strided_slice %12 {offsets = [0, 0], sizes = [8, 8], strides = [1, 1]} : vector<8x32xf32> to vector<8x8xf32>
    %cst = arith.constant dense<0.000000e+00> : vector<8x8xf32>
    %18 = tpu.matmul %15, %16, %cst {dimension_numbers = #tpu.dot_dimension_numbers<[1], [1], [0], [0], [0, 0, 1, 0], [], []>} : vector<8x8xf32>, vector<8x8xf32>, vector<8x8xf32> -> vector<8x8xf32>
    %19 = vector.broadcast %14 : vector<1x8xf32> to vector<8x8xf32>
    %20 = arith.addf %18, %19 : vector<8x8xf32>
    %c0_10 = arith.constant 0 : index
    %c0_11 = arith.constant 0 : index
    %c0_12 = arith.constant 0 : index
    %21 = vector.load %arg9[%c0_10, %c0_11, %c0_12] : memref<4x8x1xf32, #tpu.memory_space<vmem>>, vector<1x8x1xf32>
    %22 = vector.shape_cast %21 : vector<1x8x1xf32> to vector<8x1xf32>
    %cst_13 = arith.constant dense<0xFF800000> : vector<8xf32>
    %23 = vector.multi_reduction <maximumf>, %20, %cst_13 [1] : vector<8x8xf32> to vector<8xf32>
    %24 = vector.shape_cast %23 : vector<8xf32> to vector<8x1xf32>
    %25 = arith.maximumf %22, %24 : vector<8x1xf32>
    %26 = arith.subf %22, %25 : vector<8x1xf32>
    %27 = math.exp %26 : vector<8x1xf32>
    %28 = vector.broadcast %25 : vector<8x1xf32> to vector<8x8xf32>
    %29 = arith.subf %20, %28 : vector<8x8xf32>
    %30 = math.exp %29 : vector<8x8xf32>
    %c0_14 = arith.constant 0 : index
    %c0_15 = arith.constant 0 : index
    %c0_16 = arith.constant 0 : index
    %31 = vector.load %arg10[%c0_14, %c0_15, %c0_16] : memref<4x8x1xf32, #tpu.memory_space<vmem>>, vector<1x8x1xf32>
    %32 = vector.shape_cast %31 : vector<1x8x1xf32> to vector<8x1xf32>
    %33 = arith.mulf %27, %32 : vector<8x1xf32>
    %cst_17 = arith.constant dense<0.000000e+00> : vector<8xf32>
    %34 = vector.multi_reduction <add>, %30, %cst_17 [1] : vector<8x8xf32> to vector<8xf32>
    %35 = vector.shape_cast %34 : vector<8xf32> to vector<8x1xf32>
    %36 = arith.addf %33, %35 : vector<8x1xf32>
    %c0_18 = arith.constant 0 : index
    %c0_19 = arith.constant 0 : index
    %c0_20 = arith.constant 0 : index
    %37 = vector.load %arg10[%c0_18, %c0_19, %c0_20] : memref<4x8x1xf32, #tpu.memory_space<vmem>>, vector<1x8x1xf32>
    %38 = vector.shape_cast %37 : vector<1x8x1xf32> to vector<8x1xf32>
    %39 = vector.shape_cast %36 : vector<8x1xf32> to vector<1x8x1xf32>
    tpu.vector_store %arg10[%c0_18, %c0_19, %c0_20], %39 {strides = array<i32>} : memref<4x8x1xf32, #tpu.memory_space<vmem>>, vector<1x8x1xf32>,
    %c0_21 = arith.constant 0 : index
    %c0_22 = arith.constant 0 : index
    %c0_23 = arith.constant 0 : index
    %40 = vector.load %arg11[%c0_21, %c0_22, %c0_23] : memref<4x8x8xf32, #tpu.memory_space<vmem>>, vector<1x8x8xf32>
    %41 = vector.shape_cast %40 : vector<1x8x8xf32> to vector<8x8xf32>
    %42 = vector.broadcast %27 : vector<8x1xf32> to vector<8x8xf32>
    %43 = arith.mulf %42, %41 : vector<8x8xf32>
    %cst_24 = arith.constant dense<0.000000e+00> : vector<8x8xf32>
    %44 = tpu.matmul %30, %17, %cst_24 {dimension_numbers = #tpu.dot_dimension_numbers<[1], [0], [0], [1], [0, 0, 1, 1], [], []>} : vector<8x8xf32>, vector<8x8xf32>, vector<8x8xf32> -> vector<8x8xf32>
    %45 = arith.addf %43, %44 : vector<8x8xf32>
    %c0_25 = arith.constant 0 : index
    %c0_26 = arith.constant 0 : index
    %c0_27 = arith.constant 0 : index
    %46 = vector.load %arg11[%c0_25, %c0_26, %c0_27] : memref<4x8x8xf32, #tpu.memory_space<vmem>>, vector<1x8x8xf32>
    %47 = vector.shape_cast %46 : vector<1x8x8xf32> to vector<8x8xf32>
    %48 = vector.shape_cast %45 : vector<8x8xf32> to vector<1x8x8xf32>
    tpu.vector_store %arg11[%c0_25, %c0_26, %c0_27], %48 {strides = array<i32>} : memref<4x8x8xf32, #tpu.memory_space<vmem>>, vector<1x8x8xf32>,
    %c0_28 = arith.constant 0 : index
    %c0_29 = arith.constant 0 : index
    %c0_30 = arith.constant 0 : index
    %49 = vector.load %arg9[%c0_28, %c0_29, %c0_30] : memref<4x8x1xf32, #tpu.memory_space<vmem>>, vector<1x8x1xf32>
    %50 = vector.shape_cast %49 : vector<1x8x1xf32> to vector<8x1xf32>
    %51 = vector.shape_cast %25 : vector<8x1xf32> to vector<1x8x1xf32>
    tpu.vector_store %arg9[%c0_28, %c0_29, %c0_30], %51 {strides = array<i32>} : memref<4x8x1xf32, #tpu.memory_space<vmem>>, vector<1x8x1xf32>,
    %52 = vector.extract_strided_slice %6 {offsets = [0, 8], sizes = [8, 8], strides = [1, 1]} : vector<8x32xf32> to vector<8x8xf32>
    %53 = vector.extract_strided_slice %9 {offsets = [0, 8], sizes = [8, 8], strides = [1, 1]} : vector<8x32xf32> to vector<8x8xf32>
    %54 = vector.extract_strided_slice %12 {offsets = [0, 8], sizes = [8, 8], strides = [1, 1]} : vector<8x32xf32> to vector<8x8xf32>
    %cst_31 = arith.constant dense<0.000000e+00> : vector<8x8xf32>
    %55 = tpu.matmul %52, %53, %cst_31 {dimension_numbers = #tpu.dot_dimension_numbers<[1], [1], [0], [0], [0, 0, 1, 0], [], []>} : vector<8x8xf32>, vector<8x8xf32>, vector<8x8xf32> -> vector<8x8xf32>
    %56 = vector.broadcast %14 : vector<1x8xf32> to vector<8x8xf32>
    %57 = arith.addf %55, %56 : vector<8x8xf32>
    %c1 = arith.constant 1 : index
    %c0_32 = arith.constant 0 : index
    %c0_33 = arith.constant 0 : index
    %58 = vector.load %arg9[%c1, %c0_32, %c0_33] : memref<4x8x1xf32, #tpu.memory_space<vmem>>, vector<1x8x1xf32>
    %59 = vector.shape_cast %58 : vector<1x8x1xf32> to vector<8x1xf32>
    %cst_34 = arith.constant dense<0xFF800000> : vector<8xf32>
    %60 = vector.multi_reduction <maximumf>, %57, %cst_34 [1] : vector<8x8xf32> to vector<8xf32>
    %61 = vector.shape_cast %60 : vector<8xf32> to vector<8x1xf32>
    %62 = arith.maximumf %59, %61 : vector<8x1xf32>
    %63 = arith.subf %59, %62 : vector<8x1xf32>
    %64 = math.exp %63 : vector<8x1xf32>
    %65 = vector.broadcast %62 : vector<8x1xf32> to vector<8x8xf32>
    %66 = arith.subf %57, %65 : vector<8x8xf32>
    %67 = math.exp %66 : vector<8x8xf32>
    %c1_35 = arith.constant 1 : index
    %c0_36 = arith.constant 0 : index
    %c0_37 = arith.constant 0 : index
    %68 = vector.load %arg10[%c1_35, %c0_36, %c0_37] : memref<4x8x1xf32, #tpu.memory_space<vmem>>, vector<1x8x1xf32>
    %69 = vector.shape_cast %68 : vector<1x8x1xf32> to vector<8x1xf32>
    %70 = arith.mulf %64, %69 : vector<8x1xf32>
    %cst_38 = arith.constant dense<0.000000e+00> : vector<8xf32>
    %71 = vector.multi_reduction <add>, %67, %cst_38 [1] : vector<8x8xf32> to vector<8xf32>
    %72 = vector.shape_cast %71 : vector<8xf32> to vector<8x1xf32>
    %73 = arith.addf %70, %72 : vector<8x1xf32>
    %c1_39 = arith.constant 1 : index
    %c0_40 = arith.constant 0 : index
    %c0_41 = arith.constant 0 : index
    %74 = vector.load %arg10[%c1_39, %c0_40, %c0_41] : memref<4x8x1xf32, #tpu.memory_space<vmem>>, vector<1x8x1xf32>
    %75 = vector.shape_cast %74 : vector<1x8x1xf32> to vector<8x1xf32>
    %76 = vector.shape_cast %73 : vector<8x1xf32> to vector<1x8x1xf32>
    tpu.vector_store %arg10[%c1_39, %c0_40, %c0_41], %76 {strides = array<i32>} : memref<4x8x1xf32, #tpu.memory_space<vmem>>, vector<1x8x1xf32>,
    %c1_42 = arith.constant 1 : index
    %c0_43 = arith.constant 0 : index
    %c0_44 = arith.constant 0 : index
    %77 = vector.load %arg11[%c1_42, %c0_43, %c0_44] : memref<4x8x8xf32, #tpu.memory_space<vmem>>, vector<1x8x8xf32>
    %78 = vector.shape_cast %77 : vector<1x8x8xf32> to vector<8x8xf32>
    %79 = vector.broadcast %64 : vector<8x1xf32> to vector<8x8xf32>
    %80 = arith.mulf %79, %78 : vector<8x8xf32>
    %cst_45 = arith.constant dense<0.000000e+00> : vector<8x8xf32>
    %81 = tpu.matmul %67, %54, %cst_45 {dimension_numbers = #tpu.dot_dimension_numbers<[1], [0], [0], [1], [0, 0, 1, 1], [], []>} : vector<8x8xf32>, vector<8x8xf32>, vector<8x8xf32> -> vector<8x8xf32>
    %82 = arith.addf %80, %81 : vector<8x8xf32>
    %c1_46 = arith.constant 1 : index
    %c0_47 = arith.constant 0 : index
    %c0_48 = arith.constant 0 : index
    %83 = vector.load %arg11[%c1_46, %c0_47, %c0_48] : memref<4x8x8xf32, #tpu.memory_space<vmem>>, vector<1x8x8xf32>
    %84 = vector.shape_cast %83 : vector<1x8x8xf32> to vector<8x8xf32>
    %85 = vector.shape_cast %82 : vector<8x8xf32> to vector<1x8x8xf32>
    tpu.vector_store %arg11[%c1_46, %c0_47, %c0_48], %85 {strides = array<i32>} : memref<4x8x8xf32, #tpu.memory_space<vmem>>, vector<1x8x8xf32>,
    %c1_49 = arith.constant 1 : index
    %c0_50 = arith.constant 0 : index
    %c0_51 = arith.constant 0 : index
    %86 = vector.load %arg9[%c1_49, %c0_50, %c0_51] : memref<4x8x1xf32, #tpu.memory_space<vmem>>, vector<1x8x1xf32>
    %87 = vector.shape_cast %86 : vector<1x8x1xf32> to vector<8x1xf32>
    %88 = vector.shape_cast %62 : vector<8x1xf32> to vector<1x8x1xf32>
    tpu.vector_store %arg9[%c1_49, %c0_50, %c0_51], %88 {strides = array<i32>} : memref<4x8x1xf32, #tpu.memory_space<vmem>>, vector<1x8x1xf32>,
    %89 = vector.extract_strided_slice %6 {offsets = [0, 16], sizes = [8, 8], strides = [1, 1]} : vector<8x32xf32> to vector<8x8xf32>
    %90 = vector.extract_strided_slice %9 {offsets = [0, 16], sizes = [8, 8], strides = [1, 1]} : vector<8x32xf32> to vector<8x8xf32>
    %91 = vector.extract_strided_slice %12 {offsets = [0, 16], sizes = [8, 8], strides = [1, 1]} : vector<8x32xf32> to vector<8x8xf32>
    %cst_52 = arith.constant dense<0.000000e+00> : vector<8x8xf32>
    %92 = tpu.matmul %89, %90, %cst_52 {dimension_numbers = #tpu.dot_dimension_numbers<[1], [1], [0], [0], [0, 0, 1, 0], [], []>} : vector<8x8xf32>, vector<8x8xf32>, vector<8x8xf32> -> vector<8x8xf32>
    %93 = vector.broadcast %14 : vector<1x8xf32> to vector<8x8xf32>
    %94 = arith.addf %92, %93 : vector<8x8xf32>
    %c2 = arith.constant 2 : index
    %c0_53 = arith.constant 0 : index
    %c0_54 = arith.constant 0 : index
    %95 = vector.load %arg9[%c2, %c0_53, %c0_54] : memref<4x8x1xf32, #tpu.memory_space<vmem>>, vector<1x8x1xf32>
    %96 = vector.shape_cast %95 : vector<1x8x1xf32> to vector<8x1xf32>
    %cst_55 = arith.constant dense<0xFF800000> : vector<8xf32>
    %97 = vector.multi_reduction <maximumf>, %94, %cst_55 [1] : vector<8x8xf32> to vector<8xf32>
    %98 = vector.shape_cast %97 : vector<8xf32> to vector<8x1xf32>
    %99 = arith.maximumf %96, %98 : vector<8x1xf32>
    %100 = arith.subf %96, %99 : vector<8x1xf32>
    %101 = math.exp %100 : vector<8x1xf32>
    %102 = vector.broadcast %99 : vector<8x1xf32> to vector<8x8xf32>
    %103 = arith.subf %94, %102 : vector<8x8xf32>
    %104 = math.exp %103 : vector<8x8xf32>
    %c2_56 = arith.constant 2 : index
    %c0_57 = arith.constant 0 : index
    %c0_58 = arith.constant 0 : index
    %105 = vector.load %arg10[%c2_56, %c0_57, %c0_58] : memref<4x8x1xf32, #tpu.memory_space<vmem>>, vector<1x8x1xf32>
    %106 = vector.shape_cast %105 : vector<1x8x1xf32> to vector<8x1xf32>
    %107 = arith.mulf %101, %106 : vector<8x1xf32>
    %cst_59 = arith.constant dense<0.000000e+00> : vector<8xf32>
    %108 = vector.multi_reduction <add>, %104, %cst_59 [1] : vector<8x8xf32> to vector<8xf32>
    %109 = vector.shape_cast %108 : vector<8xf32> to vector<8x1xf32>
    %110 = arith.addf %107, %109 : vector<8x1xf32>
    %c2_60 = arith.constant 2 : index
    %c0_61 = arith.constant 0 : index
    %c0_62 = arith.constant 0 : index
    %111 = vector.load %arg10[%c2_60, %c0_61, %c0_62] : memref<4x8x1xf32, #tpu.memory_space<vmem>>, vector<1x8x1xf32>
    %112 = vector.shape_cast %111 : vector<1x8x1xf32> to vector<8x1xf32>
    %113 = vector.shape_cast %110 : vector<8x1xf32> to vector<1x8x1xf32>
    tpu.vector_store %arg10[%c2_60, %c0_61, %c0_62], %113 {strides = array<i32>} : memref<4x8x1xf32, #tpu.memory_space<vmem>>, vector<1x8x1xf32>,
    %c2_63 = arith.constant 2 : index
    %c0_64 = arith.constant 0 : index
    %c0_65 = arith.constant 0 : index
    %114 = vector.load %arg11[%c2_63, %c0_64, %c0_65] : memref<4x8x8xf32, #tpu.memory_space<vmem>>, vector<1x8x8xf32>
    %115 = vector.shape_cast %114 : vector<1x8x8xf32> to vector<8x8xf32>
    %116 = vector.broadcast %101 : vector<8x1xf32> to vector<8x8xf32>
    %117 = arith.mulf %116, %115 : vector<8x8xf32>
    %cst_66 = arith.constant dense<0.000000e+00> : vector<8x8xf32>
    %118 = tpu.matmul %104, %91, %cst_66 {dimension_numbers = #tpu.dot_dimension_numbers<[1], [0], [0], [1], [0, 0, 1, 1], [], []>} : vector<8x8xf32>, vector<8x8xf32>, vector<8x8xf32> -> vector<8x8xf32>
    %119 = arith.addf %117, %118 : vector<8x8xf32>
    %c2_67 = arith.constant 2 : index
    %c0_68 = arith.constant 0 : index
    %c0_69 = arith.constant 0 : index
    %120 = vector.load %arg11[%c2_67, %c0_68, %c0_69] : memref<4x8x8xf32, #tpu.memory_space<vmem>>, vector<1x8x8xf32>
    %121 = vector.shape_cast %120 : vector<1x8x8xf32> to vector<8x8xf32>
    %122 = vector.shape_cast %119 : vector<8x8xf32> to vector<1x8x8xf32>
    tpu.vector_store %arg11[%c2_67, %c0_68, %c0_69], %122 {strides = array<i32>} : memref<4x8x8xf32, #tpu.memory_space<vmem>>, vector<1x8x8xf32>,
    %c2_70 = arith.constant 2 : index
    %c0_71 = arith.constant 0 : index
    %c0_72 = arith.constant 0 : index
    %123 = vector.load %arg9[%c2_70, %c0_71, %c0_72] : memref<4x8x1xf32, #tpu.memory_space<vmem>>, vector<1x8x1xf32>
    %124 = vector.shape_cast %123 : vector<1x8x1xf32> to vector<8x1xf32>
    %125 = vector.shape_cast %99 : vector<8x1xf32> to vector<1x8x1xf32>
    tpu.vector_store %arg9[%c2_70, %c0_71, %c0_72], %125 {strides = array<i32>} : memref<4x8x1xf32, #tpu.memory_space<vmem>>, vector<1x8x1xf32>,
    %126 = vector.extract_strided_slice %6 {offsets = [0, 24], sizes = [8, 8], strides = [1, 1]} : vector<8x32xf32> to vector<8x8xf32>
    %127 = vector.extract_strided_slice %9 {offsets = [0, 24], sizes = [8, 8], strides = [1, 1]} : vector<8x32xf32> to vector<8x8xf32>
    %128 = vector.extract_strided_slice %12 {offsets = [0, 24], sizes = [8, 8], strides = [1, 1]} : vector<8x32xf32> to vector<8x8xf32>
    %cst_73 = arith.constant dense<0.000000e+00> : vector<8x8xf32>
    %129 = tpu.matmul %126, %127, %cst_73 {dimension_numbers = #tpu.dot_dimension_numbers<[1], [1], [0], [0], [0, 0, 1, 0], [], []>} : vector<8x8xf32>, vector<8x8xf32>, vector<8x8xf32> -> vector<8x8xf32>
    %130 = vector.broadcast %14 : vector<1x8xf32> to vector<8x8xf32>
    %131 = arith.addf %129, %130 : vector<8x8xf32>
    %c3 = arith.constant 3 : index
    %c0_74 = arith.constant 0 : index
    %c0_75 = arith.constant 0 : index
    %132 = vector.load %arg9[%c3, %c0_74, %c0_75] : memref<4x8x1xf32, #tpu.memory_space<vmem>>, vector<1x8x1xf32>
    %133 = vector.shape_cast %132 : vector<1x8x1xf32> to vector<8x1xf32>
    %cst_76 = arith.constant dense<0xFF800000> : vector<8xf32>
    %134 = vector.multi_reduction <maximumf>, %131, %cst_76 [1] : vector<8x8xf32> to vector<8xf32>
    %135 = vector.shape_cast %134 : vector<8xf32> to vector<8x1xf32>
    %136 = arith.maximumf %133, %135 : vector<8x1xf32>
    %137 = arith.subf %133, %136 : vector<8x1xf32>
    %138 = math.exp %137 : vector<8x1xf32>
    %139 = vector.broadcast %136 : vector<8x1xf32> to vector<8x8xf32>
    %140 = arith.subf %131, %139 : vector<8x8xf32>
    %141 = math.exp %140 : vector<8x8xf32>
    %c3_77 = arith.constant 3 : index
    %c0_78 = arith.constant 0 : index
    %c0_79 = arith.constant 0 : index
    %142 = vector.load %arg10[%c3_77, %c0_78, %c0_79] : memref<4x8x1xf32, #tpu.memory_space<vmem>>, vector<1x8x1xf32>
    %143 = vector.shape_cast %142 : vector<1x8x1xf32> to vector<8x1xf32>
    %144 = arith.mulf %138, %143 : vector<8x1xf32>
    %cst_80 = arith.constant dense<0.000000e+00> : vector<8xf32>
    %145 = vector.multi_reduction <add>, %141, %cst_80 [1] : vector<8x8xf32> to vector<8xf32>
    %146 = vector.shape_cast %145 : vector<8xf32> to vector<8x1xf32>
    %147 = arith.addf %144, %146 : vector<8x1xf32>
    %c3_81 = arith.constant 3 : index
    %c0_82 = arith.constant 0 : index
    %c0_83 = arith.constant 0 : index
    %148 = vector.load %arg10[%c3_81, %c0_82, %c0_83] : memref<4x8x1xf32, #tpu.memory_space<vmem>>, vector<1x8x1xf32>
    %149 = vector.shape_cast %148 : vector<1x8x1xf32> to vector<8x1xf32>
    %150 = vector.shape_cast %147 : vector<8x1xf32> to vector<1x8x1xf32>
    tpu.vector_store %arg10[%c3_81, %c0_82, %c0_83], %150 {strides = array<i32>} : memref<4x8x1xf32, #tpu.memory_space<vmem>>, vector<1x8x1xf32>,
    %c3_84 = arith.constant 3 : index
    %c0_85 = arith.constant 0 : index
    %c0_86 = arith.constant 0 : index
    %151 = vector.load %arg11[%c3_84, %c0_85, %c0_86] : memref<4x8x8xf32, #tpu.memory_space<vmem>>, vector<1x8x8xf32>
    %152 = vector.shape_cast %151 : vector<1x8x8xf32> to vector<8x8xf32>
    %153 = vector.broadcast %138 : vector<8x1xf32> to vector<8x8xf32>
    %154 = arith.mulf %153, %152 : vector<8x8xf32>
    %cst_87 = arith.constant dense<0.000000e+00> : vector<8x8xf32>
    %155 = tpu.matmul %141, %128, %cst_87 {dimension_numbers = #tpu.dot_dimension_numbers<[1], [0], [0], [1], [0, 0, 1, 1], [], []>} : vector<8x8xf32>, vector<8x8xf32>, vector<8x8xf32> -> vector<8x8xf32>
    %156 = arith.addf %154, %155 : vector<8x8xf32>
    %c3_88 = arith.constant 3 : index
    %c0_89 = arith.constant 0 : index
    %c0_90 = arith.constant 0 : index
    %157 = vector.load %arg11[%c3_88, %c0_89, %c0_90] : memref<4x8x8xf32, #tpu.memory_space<vmem>>, vector<1x8x8xf32>
    %158 = vector.shape_cast %157 : vector<1x8x8xf32> to vector<8x8xf32>
    %159 = vector.shape_cast %156 : vector<8x8xf32> to vector<1x8x8xf32>
    tpu.vector_store %arg11[%c3_88, %c0_89, %c0_90], %159 {strides = array<i32>} : memref<4x8x8xf32, #tpu.memory_space<vmem>>, vector<1x8x8xf32>,
    %c3_91 = arith.constant 3 : index
    %c0_92 = arith.constant 0 : index
    %c0_93 = arith.constant 0 : index
    %160 = vector.load %arg9[%c3_91, %c0_92, %c0_93] : memref<4x8x1xf32, #tpu.memory_space<vmem>>, vector<1x8x1xf32>
    %161 = vector.shape_cast %160 : vector<1x8x1xf32> to vector<8x1xf32>
    %162 = vector.shape_cast %136 : vector<8x1xf32> to vector<1x8x1xf32>
    tpu.vector_store %arg9[%c3_91, %c0_92, %c0_93], %162 {strides = array<i32>} : memref<4x8x1xf32, #tpu.memory_space<vmem>>, vector<1x8x1xf32>,
    %c0_i32_94 = arith.constant 0 : i32
    %163 = arith.cmpi eq, %arg3, %c0_i32_94 : i32
    %164 = arith.extui %163 : i1 to i32
    %c0_i32_95 = arith.constant 0 : i32
    %165 = arith.cmpi ne, %164, %c0_i32_95 : i32
    scf.if %165 {
      %c0_96 = arith.constant 0 : index
      %c0_97 = arith.constant 0 : index
      %c0_98 = arith.constant 0 : index
      %166 = vector.load %arg10[%c0_96, %c0_97, %c0_98] : memref<4x8x1xf32, #tpu.memory_space<vmem>>, vector<1x8x1xf32>
      %167 = vector.shape_cast %166 : vector<1x8x1xf32> to vector<8x1xf32>
      %168 = tpu.reciprocal %167 : vector<8x1xf32> -> vector<8x1xf32>
      %c0_99 = arith.constant 0 : index
      %c0_100 = arith.constant 0 : index
      %c0_101 = arith.constant 0 : index
      %169 = vector.load %arg11[%c0_99, %c0_100, %c0_101] : memref<4x8x8xf32, #tpu.memory_space<vmem>>, vector<1x8x8xf32>
      %170 = vector.shape_cast %169 : vector<1x8x8xf32> to vector<8x8xf32>
      %171 = vector.broadcast %168 : vector<8x1xf32> to vector<8x8xf32>
      %172 = arith.mulf %170, %171 : vector<8x8xf32>
      %c1_102 = arith.constant 1 : index
      %c0_103 = arith.constant 0 : index
      %c0_104 = arith.constant 0 : index
      %173 = vector.load %arg10[%c1_102, %c0_103, %c0_104] : memref<4x8x1xf32, #tpu.memory_space<vmem>>, vector<1x8x1xf32>
      %174 = vector.shape_cast %173 : vector<1x8x1xf32> to vector<8x1xf32>
      %175 = tpu.reciprocal %174 : vector<8x1xf32> -> vector<8x1xf32>
      %c1_105 = arith.constant 1 : index
      %c0_106 = arith.constant 0 : index
      %c0_107 = arith.constant 0 : index
      %176 = vector.load %arg11[%c1_105, %c0_106, %c0_107] : memref<4x8x8xf32, #tpu.memory_space<vmem>>, vector<1x8x8xf32>
      %177 = vector.shape_cast %176 : vector<1x8x8xf32> to vector<8x8xf32>
      %178 = vector.broadcast %175 : vector<8x1xf32> to vector<8x8xf32>
      %179 = arith.mulf %177, %178 : vector<8x8xf32>
      %c2_108 = arith.constant 2 : index
      %c0_109 = arith.constant 0 : index
      %c0_110 = arith.constant 0 : index
      %180 = vector.load %arg10[%c2_108, %c0_109, %c0_110] : memref<4x8x1xf32, #tpu.memory_space<vmem>>, vector<1x8x1xf32>
      %181 = vector.shape_cast %180 : vector<1x8x1xf32> to vector<8x1xf32>
      %182 = tpu.reciprocal %181 : vector<8x1xf32> -> vector<8x1xf32>
      %c2_111 = arith.constant 2 : index
      %c0_112 = arith.constant 0 : index
      %c0_113 = arith.constant 0 : index
      %183 = vector.load %arg11[%c2_111, %c0_112, %c0_113] : memref<4x8x8xf32, #tpu.memory_space<vmem>>, vector<1x8x8xf32>
      %184 = vector.shape_cast %183 : vector<1x8x8xf32> to vector<8x8xf32>
      %185 = vector.broadcast %182 : vector<8x1xf32> to vector<8x8xf32>
      %186 = arith.mulf %184, %185 : vector<8x8xf32>
      %c3_114 = arith.constant 3 : index
      %c0_115 = arith.constant 0 : index
      %c0_116 = arith.constant 0 : index
      %187 = vector.load %arg10[%c3_114, %c0_115, %c0_116] : memref<4x8x1xf32, #tpu.memory_space<vmem>>, vector<1x8x1xf32>
      %188 = vector.shape_cast %187 : vector<1x8x1xf32> to vector<8x1xf32>
      %189 = tpu.reciprocal %188 : vector<8x1xf32> -> vector<8x1xf32>
      %c3_117 = arith.constant 3 : index
      %c0_118 = arith.constant 0 : index
      %c0_119 = arith.constant 0 : index
      %190 = vector.load %arg11[%c3_117, %c0_118, %c0_119] : memref<4x8x8xf32, #tpu.memory_space<vmem>>, vector<1x8x8xf32>
      %191 = vector.shape_cast %190 : vector<1x8x8xf32> to vector<8x8xf32>
      %192 = vector.broadcast %189 : vector<8x1xf32> to vector<8x8xf32>
      %193 = arith.mulf %191, %192 : vector<8x8xf32>
      %194 = tpu.concatenate %172, %179, %186, %193 in 1 : vector<8x8xf32>, vector<8x8xf32>, vector<8x8xf32>, vector<8x8xf32> -> vector<8x32xf32>
      %c0_120 = arith.constant 0 : index
      %c0_121 = arith.constant 0 : index
      %c0_122 = arith.constant 0 : index
      %195 = vector.load %arg8[%c0_120, %c0_121, %c0_122] : memref<1x8x32xf32, #tpu.memory_space<vmem>>, vector<1x8x32xf32>
      %196 = vector.shape_cast %195 : vector<1x8x32xf32> to vector<8x32xf32>
      %197 = vector.shape_cast %194 : vector<8x32xf32> to vector<1x8x32xf32>
      tpu.vector_store %arg8[%c0_120, %c0_121, %c0_122], %197 {strides = array<i32>} : memref<1x8x32xf32, #tpu.memory_space<vmem>>, vector<1x8x32xf32>,
    } else {
    }
    return
  }
  func.func @transform_0(%arg0: i32, %arg1: i32, %arg2: i32, %arg3: i32) -> (i32, i32, i32) {
    %c0_i32 = arith.constant 0 : i32
    return %arg0, %arg2, %arg1 : i32, i32, i32
  }
  func.func @transform_1(%arg0: i32, %arg1: i32, %arg2: i32, %arg3: i32) -> (i32, i32, i32) {
    %c0_i32 = arith.constant 0 : i32
    %c0_i32_0 = arith.constant 0 : i32
    return %arg0, %c0_i32, %arg1 : i32, i32, i32
  }
  func.func @transform_2(%arg0: i32, %arg1: i32, %arg2: i32, %arg3: i32) -> (i32, i32, i32) {
    %c0_i32 = arith.constant 0 : i32
    %c0_i32_0 = arith.constant 0 : i32
    return %arg0, %c0_i32, %arg1 : i32, i32, i32
  }
  func.func @transform_3(%arg0: i32, %arg1: i32, %arg2: i32, %arg3: i32) -> (i32, i32, i32) {
    %c0_i32 = arith.constant 0 : i32
    %c0_i32_0 = arith.constant 0 : i32
    return %arg0, %c0_i32, %arg3 : i32, i32, i32
  }
  func.func @transform_4(%arg0: i32, %arg1: i32, %arg2: i32, %arg3: i32) -> (i32, i32, i32) {
    %c0_i32 = arith.constant 0 : i32
    return %arg0, %arg2, %arg1 : i32, i32, i32
  }
}

</mosaic_0001>

<bundles_post_ra>
// kernel: multi_head_attention.2
= control target key start
LH: loop header
LB: loop body
LE: loop exit
PB: predicated region body
PF: predicated region fallthrough
CT: control target
= control target key end

     0   :  { %s663_s18 = smov 0   ;;  %s665_s19 = smov 0   ;;  %s721_s0 = inlined_call_operand.vmem [shape: f32[2,8,32], index: 0, kind: input, shape index: {}]   ;;  %s722_s1 = inlined_call_operand.vmem [shape: f32[32,96], index: 1, kind: input, shape index: {}]   ;;  %s723_s2 = inlined_call_operand.vmem [shape: f32[1,96], index: 2, kind: input, shape index: {}]   ;;  %s724_s3 = inlined_call_operand.vmem [shape: f32[2,8,32], index: 3, kind: output, shape index: {0}]   ;;  %s725_s4 = inlined_call_operand.vmem [shape: f32[2,8,32], index: 4, kind: output, shape index: {1}]   ;;  %s726_s5 = inlined_call_operand.vmem [shape: f32[2,8,32], index: 5, kind: output, shape index: {2}]  }
   0x1   :  { %s667_s20 = smov 0  }
   0x2 LB: > { %s28_s21 = sadd.s32 1, %s622_s19  ;;  %p544_p0 = scmp.ge.s32.totalorder %s626_s20, 1  ;;  %s626_s20 = sphi %s667_s20, %s16_s20   ;;  %s622_s19 = sphi %s665_s19, %s728_s19   ;;  %s618_s18 = sphi %s663_s18, %s727_s18  }
   0x3   : > { %p30_p1 = scmp.ge.s32.totalorder %s28_s21, 2  ;;  %p214_p2 = scmp.lt.s32.totalorder %s626_s20, 3 }
   0x5   : > { %s730_s21 = smov (%p30_p1, %s28_s21), 0  ;;  %p215_p3 = pnand %p544_p0, %p214_p2 }
   0x6   : > { %v289_v0 = vld [vmem:[%s722_s1] sm:$0xff] (!%p215_p3)  ;;  %v290_v1 = vld [vmem:[%s722_s1 + $0x8] sm:$0xff] (!%p215_p3)  ;;  %v291_v2 = vld [vmem:[%s722_s1 + $0x10] sm:$0xff] (!%p215_p3)  ;;  %v628_v3 = vmov (!%p215_p3), 0.0|0.0   ;;  %vm629_vm0 = vmmov (!%p215_p3), 0   ;;  %v630_v6 = vmov (!%p215_p3), 0.0  }
   0x7   : > { %218 = sbr.rel (%p215_p3) target bundleno = 352 (0x160), region = 32  ;;  %569 = vmatprep.subr.bf16.mxu0 (!%p215_p3), %v628_v3  ;;  %v570_v4 = vpack.c.bf16 (!%p215_p3), %v290_v1, %v289_v0  ;;  %v292_v5 = vld [vmem:[%s722_s1 + $0x18] sm:$0xff] (!%p215_p3)  ;;  %566 = vmatprep.mubr.msk.f32.mxu0 (!%p215_p3), %vm629_vm0, %v630_v6  ;;  %p260_p4 = scmp.lt.s32.totalorder (!%p215_p3), %s618_s18, 1  ;;  %vm300_vm1 = vcmask (!%p215_p3), 261120   ;;  %v549_v9 = vld [vmem:[%s723_s2] ss:$0 sm:$0xff] (!%p215_p3) }
   0x8   : > { %v573_v7 = vpack.c.bf16 (!%p215_p3), %v292_v5, %v291_v2  ;;  %s631_s14 = smov (!%p215_p3), 96   ;;  %s632_s15 = smov (!%p215_p3), 64  }
   0x9   : > { %571 = vmatpush3.bf16.msra.mxu0 (!%p215_p3), %v570_v4 }
   0xa   : > { %572 = vmatprep.subr.bf16.mxu0 (!%p215_p3), %v628_v3 }
   0xd   : > { %574 = vmatpush3.bf16.msra.mxu0 (!%p215_p3), %v573_v7 }
   0xe   : > { %s732_s18 = smov (!%p260_p4, %s618_s18), 1 }
   0xf   : > { %s545_s30 = sshll.u32 %s732_s18, 3 }
  0x10   : > { %s266_s8 = scalar_lea.vmem %s721_s0, %s545_s30  ;;  %s273_s13 = scalar_lea.vmem %s724_s3, %s545_s30 }
  0x11   : > { %v288_v8 = vld [vmem:[%s266_s8] sm:$0xff]  ;;  %s280_s18 = scalar_lea.vmem %s725_s4, %s545_s30  ;;  %s287_s24 = scalar_lea.vmem %s726_s5, %s545_s30 }
  0x12   : > { %567 = vmatmul.mubr.msk.f32.vlgmr.msra.gmra.mrb[0].mxu0 %vm300_vm1, %v288_v8 }
  0xe5   : > { %v370_v10 = vpop.f32.mrb[0].mxu0 }
  0xe6   : > { %v371_v11 = vadd.f32 %v549_v9, %v370_v10  ;;  %v568_v12 = vpop.f32.mrb[1].mxu0 }
  0xe8   : > { %374 = vst.msk [vmem:[%s273_s13] sm:$0xff] %vm300_vm1, %v371_v11  ;;  %376 = vrot.lane.b32.xlu0 %v371_v11, %s631_s14 }
  0xec   : > { %380 = vrot.lane.b32.xlu0 %v371_v11, %s632_s15 }
 0x15a   : > { %v377_v13 = vpop.permute.xlu0 %376 }
 0x15b   : > { %379 = vst.msk [vmem:[%s280_s18] sm:$0xff] %vm300_vm1, %v377_v13 }
 0x15e   : > { %v381_v14 = vpop.permute.xlu0 %380 }
 0x15f   : > { %383 = vst.msk [vmem:[%s287_s24] sm:$0xff] %vm300_vm1, %v381_v14 }
 0x160 PF: > { %s16_s20 = sadd.s32 1, %s626_s20   ;;  %s727_s18 = smov %s622_s19 }
 0x161   : > { %p13_p5 = scmp.ge.s32.totalorder %s16_s20, 4   ;;  %s728_s19 = smov %s730_s21 }
 0x163   :  { %15 = sbr.rel (!%p13_p5) target bundleno = 2 (0x2), region = 86 }

// kernel: multi_head_attention.3
= control target key start
LH: loop header
LB: loop body
LE: loop exit
PB: predicated region body
PF: predicated region fallthrough
CT: control target
= control target key end

     0   :  { %9 = vsyncpa [#allocation6], 0  ;;  %s1835_s0 = inlined_call_operand.vmem [shape: f32[2,8,32], index: 0, kind: input, shape index: {}]   ;;  %s1836_s1 = inlined_call_operand.vmem [shape: f32[2,8,32], index: 1, kind: input, shape index: {}]   ;;  %s1837_s2 = inlined_call_operand.vmem [shape: f32[2,8,32], index: 2, kind: input, shape index: {}]   ;;  %s1838_s3 = inlined_call_operand.vmem [shape: f32[2,1,8], index: 3, kind: input, shape index: {}]   ;;  %s1839_s4 = inlined_call_operand.hbm [shape: f32[2,8,32], index: 4, kind: output, shape index: {}]  }
   0x1   :  { %11 = vsyncpa [#allocation6 + $0x1], 0  ;;  %s1602_s15 = smov 0   ;;  %s1604_s16 = smov 0  }
   0x2   :  { %s1606_s17 = smov 0   ;;  %s1608_s18 = smov 0  }
   0x3   :  { %s1610_s19 = smov 0   ;;  %s1612_s20 = smov 0  }
   0x4 LB: > { %s1313_s21 = sadd.s32 4294967295, %s1564_s20   ;;  %s1314_s22 = sadd.s32 4294967294, %s1564_s20   ;;  %s1564_s20 = sphi %s1612_s20, %s17_s20   ;;  %s1560_s19 = sphi %s1610_s19, %s1846_s19   ;;  %s1556_s18 = sphi %s1608_s18, %s1845_s18   ;;  %s1552_s17 = sphi %s1606_s17, %s1844_s17   ;;  %s1548_s16 = sphi %s1604_s16, %s1843_s16   ;;  %s1544_s15 = sphi %s1602_s15, %s1842_s15  }
   0x5   : > { %s43_s23 = sadd.s32 1, %s1560_s19  ;;  %s168_s24 = sadd.s32 1, %s1552_s17 }
   0x6   : > { %p45_p0 = scmp.ge.s32.totalorder %s43_s23, 2  ;;  %p178_p1 = scmp.ne.s32.totalorder %s1552_s17, %s1548_s16 }
   0x7   : > { %p179_p2 = scmp.eq.s32.totalorder %s1313_s21, 1  ;;  %p184_p3 = scmp.ne.s32.totalorder %s1548_s16, %s1544_s15 }
   0x8   : > { %s1848_s23 = smov (%p45_p0, %s43_s23), 0  ;;  %p185_p5 = scmp.eq.s32.totalorder %s1314_s22, 1 }
   0x9   : > { %p1642_p4 = por %p179_p2, %p178_p1  ;;  %s161_s26 = ssub.s32 %s1560_s19, %s1848_s23 }
   0xa   : > { %p1317_p6 = scmp.ge.s32.totalorder %s1564_s20, 1  ;;  %p166_p7 = scmp.eq.s32.totalorder %s161_s26, 0 }
   0xb   : > { %p1649_p8 = por %p185_p5, %p184_p3  ;;  %p245_p9 = scmp.lt.s32.totalorder %s1564_s20, 3 }
   0xc   : > { %s1655_s28 = scalar_select %p166_p7, %s1552_s17, %s168_s24  }
   0xd   : > { %p246_p10 = pnand %p1317_p6, %p245_p9 }
   0xe   : > { %p296_p11 = scmp.lt.s32.totalorder (!%p246_p10), %s1556_s18, 1  ;;  %vm339_vm0 = vcmask (!%p246_p10), 64512   ;;  %v1566_v0 = vmov (!%p246_p10), 0.0   ;;  %vm1567_vm1 = vmmov (!%p246_p10), 0   ;;  %vm330_vm2 = vcmask (!%p246_p10), 7168   ;;  %s1570_s14 = smov (!%p246_p10), 120  }
   0xf   : > { %249 = sbr.rel (%p246_p10) target bundleno = 1470 (0x5be), region = 36  ;;  %1355 = vmatprep.subr.mxu0 (!%p246_p10), %v1566_v0  ;;  %340 = vst.msk [vmem:[#allocation4] sm:$0xff] (!%p246_p10), %vm339_vm0, %v1566_v0  ;;  %341 = vst.msk [vmem:[#allocation4 + $0x8] sm:$0xff] (!%p246_p10), %vm339_vm0, %v1566_v0  ;;  %1357 = vmatprep.mubr.msk.f32.mxu0 (!%p246_p10), %vm1567_vm1, %v1566_v0  ;;  %v1568_v3 = vmov (!%p246_p10), -inf   ;;  %v1569_v9 = vmov (!%p246_p10), 0   ;;  %s1571_s21 = smov (!%p246_p10), 112  }
  0x10   : > { %342 = vst.msk [vmem:[#allocation4 + $0x10] sm:$0xff] (!%p246_p10), %vm339_vm0, %v1566_v0  ;;  %343 = vst.msk [vmem:[#allocation4 + $0x18] sm:$0xff] (!%p246_p10), %vm339_vm0, %v1566_v0  ;;  %1360 = vmatprep.subr.mxu1 (!%p246_p10), %v1566_v0  ;;  %1362 = vmatprep.mubr.msk.f32.mxu1 (!%p246_p10), %vm1567_vm1, %v1566_v0  ;;  %s1572_s22 = smov (!%p246_p10), 104   ;;  %s1574_s5 = smov (!%p246_p10), 16   ;;  %vm1164_vm3 = vcmask (!%p246_p10), 130048   ;;  %vm1166_vm4 = vcmask (!%p246_p10), 195584  }
  0x11   : > { %331 = vst.msk [vmem:[#allocation2] sm:$0xff] (!%p246_p10), %vm330_vm2, %v1568_v3  ;;  %332 = vst.msk [vmem:[#allocation2 + $0x8] sm:$0xff] (!%p246_p10), %vm330_vm2, %v1568_v3  ;;  %1460 = vset.pattern.permute.xlu0 (!%p246_p10), %v1569_v9  ;;  %1461 = vset.pattern.permute.xlu1 (!%p246_p10), %v1569_v9  ;;  %s1575_s6 = smov (!%p246_p10), 24   ;;  %s1336_s9 = sshll.u32 (!%p246_p10), %s1556_s18, 7  ;;  %vm1168_vm5 = vcmask (!%p246_p10), 261120  }
  0x12   : > { %333 = vst.msk [vmem:[#allocation2 + $0x10] sm:$0xff] (!%p246_p10), %vm330_vm2, %v1568_v3  ;;  %334 = vst.msk [vmem:[#allocation2 + $0x18] sm:$0xff] (!%p246_p10), %vm330_vm2, %v1568_v3 }
  0x13   : > { %335 = vst.msk [vmem:[#allocation3] sm:$0xff] (!%p246_p10), %vm330_vm2, %v1566_v0  ;;  %336 = vst.msk [vmem:[#allocation3 + $0x8] sm:$0xff] (!%p246_p10), %vm330_vm2, %v1566_v0 }
  0x14   : > { %337 = vst.msk [vmem:[#allocation3 + $0x10] sm:$0xff] (!%p246_p10), %vm330_vm2, %v1566_v0  ;;  %338 = vst.msk [vmem:[#allocation3 + $0x18] sm:$0xff] (!%p246_p10), %vm330_vm2, %v1566_v0 }
  0x16   : > { %s297_s29 = scalar_select %p296_p11, %s1556_s18, 1 }
  0x18   : > { %s1673_s30 = sshll.u32 %s297_s29, 3  ;;  %s325_s13 = scalar_lea.vmem %s1838_s3, %s297_s29  ;;  %v1713_v10 = vld [vmem:[#allocation2] sm:$0xff]  ;;  %v620_v39 = vld [vmem:[#allocation2 + $0x8] sm:$0xff] }
  0x19   : > { %s312_s7 = scalar_lea.vmem %s1836_s1, %s1673_s30  ;;  %s305_s10 = scalar_lea.vmem %s1835_s0, %s1673_s30  ;;  %v1703_v4 = vld [vmem:[%s325_s13] ss:$0 sm:$0xff]  ;;  %v811_v42 = vld [vmem:[#allocation2 + $0x10] sm:$0xff]  ;;  %v1001_v46 = vld [vmem:[#allocation2 + $0x18] sm:$0xff] }
  0x1a   : > { %v347_v1 = vld [vmem:[%s312_s7] sm:$0xff]  ;;  %s319_s29 = scalar_lea.vmem %s1837_s2, %s1673_s30  ;;  %s1573_s30 = smov 8  }
  0x1b   : > { %1356 = vmatpush3.xpose.msk.msra.mxu0 %vm339_vm0, %v347_v1  ;;  %v345_v2 = vld [vmem:[%s305_s10] sm:$0xff]  ;;  %543 = vrot.lane.b32.xlu1 %v347_v1, %s1570_s14  ;;  %s293_s7 = sand.u32 1, %s1548_s16  }
  0x1c   : > { %1370 = vmatprep.subr.mxu0 %v1566_v0  ;;  %v349_v14 = vld [vmem:[%s319_s29] sm:$0xff]  ;;  %s1318_s8 = sshll.u32 %s293_s7, 3  ;;  %s1171_s18 = scalar_lea.sflag [#allocation6], %s293_s7 }
  0x1d   : > { %1361 = vmatpush3.msra.mxu1 %v349_v14  ;;  %s295_s10 = scalar_lea.vmem [#allocation5], %s1318_s8 }
  0x1e   : > { %1358 = vmatmul.mubr.msk.f32.vlgmr.msra.gmra.mrb[0].mxu0 %vm339_vm0, %v345_v2  ;;  %1365 = vmatprep.subr.mxu1 %v1566_v0  ;;  %s1186_s11 = sshll.u32 %s295_s10, 4  ;;  %s1790_s11 = int_to_ptr.vmem [resolvable:$true] %s1186_s11 }
  0x1f   : > { %1372 = vmatprep.mubr.msk.f32.mxu0 %vm1567_vm1, %v1566_v0  ;;  %541 = vrot.lane.b32.xlu1 %v345_v2, %s1570_s14 }
  0x23   : > { %734 = vrot.lane.b32.xlu1 %v347_v1, %s1571_s21 }
  0x27   : > { %732 = vrot.lane.b32.xlu1 %v345_v2, %s1571_s21 }
  0x2b   : > { %924 = vrot.lane.b32.xlu1 %v347_v1, %s1572_s22 }
  0x2f   : > { %922 = vrot.lane.b32.xlu1 %v345_v2, %s1572_s22 }
  0x8d   : > { %v544_v15 = vpop.permute.xlu1 %543 }
  0x91   : > { %v542_v18 = vpop.permute.xlu1 %541 }
  0x95   : > { %v735_v20 = vpop.permute.xlu1 %734 }
  0x99   : > { %v733_v21 = vpop.permute.xlu1 %732 }
  0x9d   : > { %v925_v23 = vpop.permute.xlu1 %924 }
  0xa1   : > { %v923_v24 = vpop.permute.xlu1 %922 }
  0xf1   : > { %v430_v5 = vpop.f32.mrb[0].mxu0 }
  0xf2   : > { %v431_v6 = vadd.f32 %v1703_v4, %v430_v5  ;;  %v1359_v7 = vpop.f32.mrb[1].mxu0 }
  0xf4   : > { %v435_v8 = vsel %vm339_vm0, %v431_v6, -inf }
  0xf5   : > { %436 = vmax.xlane.f32.xlu0 %v435_v8 }
 0x182   : > { %v437_v11 = vpop.xlane.xlu0 %436 }
 0x183   : > { %v1716_v12 = vmax.f32 %v1713_v10, %v437_v11 }
 0x185   : > { %v439_v13 = vsub.f32 %v1713_v10, %v1716_v12  ;;  %540 = vst.msk [vmem:[#allocation2] sm:$0xff] %vm330_vm2, %v1716_v12  ;;  %444 = vperm.xlu0 %1460, %v1716_v12  }
 0x187   : > { %v440_v8 = vmul.f32 1.442695, %v439_v13  ;;  %v637_v13 = vld [vmem:[#allocation3 + $0x8] sm:$0xff] }
 0x204   : > { %v445_v16 = vpop.permute.xlu0 %444 }
 0x205   : > { %v447_v17 = vsub.f32 %v431_v6, %v445_v16 }
 0x207   : > { %v448_v19 = vmul.f32 1.442695, %v447_v17  ;;  %v450_v17 = vld [vmem:[#allocation3] sm:$0xff] }
 0x209   : > { %1462 = vpow2.f32 %v448_v19 }
 0x213   : > { %v1463_v22 = vpop.eup %1462 }
 0x214   : > { %1363 = vmatmul.mubr.msk.f32.vlgmr.msra.gmra.mrb[0].mxu1 %vm339_vm0, %v1463_v22  ;;  %v452_v51 = vsel %vm339_vm0, %v1463_v22, 0.0 }
 0x215   : > { %1366 = vmatpush3.xpose.msk.msra.mxu1 %vm339_vm0, %v544_v15  ;;  %1367 = vmatprep.mubr.msk.f32.mxu1 %vm1567_vm1, %v1566_v0 }
 0x216   : > { %1375 = vmatprep.subr.mxu1 %v1566_v0 }
 0x218   : > { %1368 = vmatmul.mubr.msk.f32.vlgmr.msra.gmra.mrb[2].mxu1 %vm339_vm0, %v542_v18 }
 0x219   : > { %1376 = vmatpush3.xpose.msk.msra.mxu1 %vm339_vm0, %v735_v20  ;;  %1377 = vmatprep.mubr.msk.f32.mxu1 %vm1567_vm1, %v1566_v0 }
 0x21a   : > { %1385 = vmatprep.subr.mxu1 %v1566_v0 }
 0x21c   : > { %1378 = vmatmul.mubr.msk.f32.vlgmr.msra.gmra.mrb[4].mxu1 %vm339_vm0, %v733_v21 }
 0x21d   : > { %1386 = vmatpush3.xpose.msk.msra.mxu1 %vm339_vm0, %v925_v23  ;;  %1387 = vmatprep.mubr.msk.f32.mxu1 %vm1567_vm1, %v1566_v0  ;;  %v828_v23 = vld [vmem:[#allocation3 + $0x10] sm:$0xff] }
 0x220   : > { %1388 = vmatmul.mubr.msk.f32.vlgmr.msra.gmra.mrb[6].mxu1 %vm339_vm0, %v923_v24 }
 0x2e7   : > { %v1743_v25 = vpop.f32.mrb[0].mxu1 }
 0x2e8   : > { %v1364_v26 = vpop.f32.mrb[1].mxu1 }
 0x2eb   : > { %v615_v27 = vpop.f32.mrb[2].mxu1 }
 0x2ec   : > { %v616_v28 = vadd.f32 %v1703_v4, %v615_v27  ;;  %v1369_v29 = vpop.f32.mrb[3].mxu1 }
 0x2ee   : > { %v621_v30 = vsel %vm339_vm0, %v616_v28, -inf }
 0x2ef   : > { %622 = vmax.xlane.f32.xlu1 %v621_v30  ;;  %v806_v31 = vpop.f32.mrb[4].mxu1 }
 0x2f0   : > { %v807_v32 = vadd.f32 %v1703_v4, %v806_v31  ;;  %v1379_v33 = vpop.f32.mrb[5].mxu1 }
 0x2f1   : > { %v458_v33 = vld [vmem:[#allocation4] sm:$0xff] }
 0x2f2   : > { %v812_v34 = vsel %vm339_vm0, %v807_v32, -inf }
 0x2f3   : > { %813 = vmax.xlane.f32.xlu0 %v812_v34  ;;  %v996_v35 = vpop.f32.mrb[6].mxu1 }
 0x2f4   : > { %v997_v36 = vadd.f32 %v1703_v4, %v996_v35  ;;  %v1389_v37 = vpop.f32.mrb[7].mxu1 }
 0x2f6   : > { %v1002_v38 = vsel %vm339_vm0, %v997_v36, -inf }
 0x2f7   : > { %1003 = vmax.xlane.f32.xlu1 %v1002_v38 }
 0x37c   : > { %v623_v40 = vpop.xlane.xlu1 %622 }
 0x37d   : > { %v624_v41 = vmax.f32 %v620_v39, %v623_v40 }
 0x37f   : > { %v625_v43 = vsub.f32 %v620_v39, %v624_v41  ;;  %731 = vst.msk [vmem:[#allocation2 + $0x8] sm:$0xff] %vm330_vm2, %v624_v41  ;;  %630 = vperm.xlu1 %1461, %v624_v41  }
 0x380   : > { %v814_v44 = vpop.xlane.xlu0 %813 }
 0x381   : > { %v815_v45 = vmax.f32 %v811_v42, %v814_v44  ;;  %v626_v7 = vmul.f32 1.442695, %v625_v43  ;;  %v645_v44 = vld [vmem:[#allocation4 + $0x8] sm:$0xff] }
 0x383   : > { %v816_v47 = vsub.f32 %v811_v42, %v815_v45  ;;  %921 = vst.msk [vmem:[#allocation2 + $0x10] sm:$0xff] %vm330_vm2, %v815_v45  ;;  %821 = vperm.xlu0 %1460, %v815_v45  }
 0x384   : > { %v1004_v48 = vpop.xlane.xlu1 %1003 }
 0x385   : > { %v1005_v49 = vmax.f32 %v1001_v46, %v1004_v48  ;;  %v817_v9 = vmul.f32 1.442695, %v816_v47 }
 0x387   : > { %v1006_v50 = vsub.f32 %v1001_v46, %v1005_v49  ;;  %1111 = vst.msk [vmem:[#allocation2 + $0x18] sm:$0xff] %vm330_vm2, %v1005_v49  ;;  %1011 = vperm.xlu1 %1461, %v1005_v49   ;;  %v836_v46 = vld [vmem:[#allocation4 + $0x10] sm:$0xff] }
 0x389   : > { %v1007_v11 = vmul.f32 1.442695, %v1006_v50 }
 0x38b   : > { %653 = vrot.lane.b32.xlu1 %v349_v14, %s1570_s14  ;;  %s1788_s14 = scalar_lea.hbm %s1839_s4, %s1336_s9 }
 0x38f   : > { %843 = vrot.lane.b32.xlu1 %v349_v14, %s1571_s21  ;;  %s1486_s21 = scalar_lea.vmem %s1790_s11, 128 }
 0x390   : > { %p1487_p12 = scmp.ne.s32.totalorder %s1790_s11, %s1486_s21 }
 0x392   : > { %p1488_p13 = pnand %p1487_p12, %p1642_p4 }
 0x393   : > { %1033 = vrot.lane.b32.xlu1 %v349_v14, %s1572_s22  ;;  %s1576_s22 = smov [#allocation5]  }
 0x394   : > { %p1489_p0 = pneg %p1488_p13  ;;  %s1490_s24 = sshll.u32 %s1576_s22, 4  ;;  %s1491_s24 = int_to_ptr.vmem [resolvable:$false] %s1490_s24 }
 0x395   : > { %s1492_s26 = scalar_lea.vmem %s1491_s24, 256  ;;  %p1493_p1 = scmp.lt.s32.totalorder %s1790_s11, %s1491_s24 }
 0x396   : > { %p1494_p2 = scmp.lt.s32.totalorder %s1492_s26, %s1486_s21 }
 0x398   : > { %p1495_p3 = por %p1494_p2, %p1493_p1 }
 0x39a   : > { %p1496_p5 = pnand %p1495_p3, %p1489_p0 }
 0x3b7   : > { %453 = vadd.xlane.f32.xlu1 %v452_v51  ;;  %v1026_v51 = vld [vmem:[#allocation4 + $0x18] sm:$0xff] }
 0x3fe   : > { %v631_v52 = vpop.permute.xlu1 %630 }
 0x3ff   : > { %v633_v53 = vsub.f32 %v616_v28, %v631_v52  ;;  %v1018_v28 = vld [vmem:[#allocation3 + $0x18] sm:$0xff] }
 0x401   : > { %v634_v54 = vmul.f32 1.442695, %v633_v53 }
 0x402   : > { %v822_v55 = vpop.permute.xlu0 %821 }
 0x403   : > { %1464 = vpow2.f32 %v634_v54  ;;  %v824_v56 = vsub.f32 %v807_v32, %v822_v55 }
 0x405   : > { %v825_v57 = vmul.f32 1.442695, %v824_v56 }
 0x406   : > { %v1012_v58 = vpop.permute.xlu1 %1011 }
 0x407   : > { %1466 = vpow2.f32 %v825_v57  ;;  %v1014_v59 = vsub.f32 %v997_v36, %v1012_v58 }
 0x409   : > { %v1015_v60 = vmul.f32 1.442695, %v1014_v59 }
 0x40a   : > { %v654_v61 = vpop.permute.xlu1 %653 }
 0x40b   : > { %1468 = vpow2.f32 %v1015_v60  ;;  %1371 = vmatpush3.msra.mxu0 %v654_v61 }
 0x40c   : > { %1380 = vmatprep.subr.mxu0 %v1566_v0  ;;  %1470 = vpow2.f32 %v626_v7 }
 0x40d   : > { %v1465_v62 = vpop.eup %1464  ;;  %1472 = vpow2.f32 %v440_v8 }
 0x40e   : > { %1373 = vmatmul.mubr.msk.f32.vlgmr.msra.gmra.mrb[2].mxu0 %vm339_vm0, %v1465_v62  ;;  %v639_v63 = vsel %vm339_vm0, %v1465_v62, 0.0  ;;  %v844_v1 = vpop.permute.xlu1 %843  ;;  %1474 = vpow2.f32 %v817_v9 }
 0x40f   : > { %640 = vadd.xlane.f32.xlu0 %v639_v63  ;;  %1381 = vmatpush3.msra.mxu0 %v844_v1  ;;  %1476 = vpow2.f32 %v1007_v11 }
 0x410   : > { %1382 = vmatprep.mubr.msk.f32.mxu0 %vm1567_vm1, %v1566_v0  ;;  %1390 = vmatprep.subr.mxu0 %v1566_v0 }
 0x411   : > { %v1467_v2 = vpop.eup %1466 }
 0x412   : > { %1383 = vmatmul.mubr.msk.f32.vlgmr.msra.gmra.mrb[4].mxu0 %vm339_vm0, %v1467_v2  ;;  %v830_v3 = vsel %vm339_vm0, %v1467_v2, 0.0  ;;  %v1034_v4 = vpop.permute.xlu1 %1033 }
 0x413   : > { %831 = vadd.xlane.f32.xlu0 %v830_v3  ;;  %1391 = vmatpush3.msra.mxu0 %v1034_v4 }
 0x414   : > { %1392 = vmatprep.mubr.msk.f32.mxu0 %vm1567_vm1, %v1566_v0 }
 0x415   : > { %v1469_v5 = vpop.eup %1468 }
 0x416   : > { %1393 = vmatmul.mubr.msk.f32.vlgmr.msra.gmra.mrb[6].mxu0 %vm339_vm0, %v1469_v5  ;;  %v1020_v6 = vsel %vm339_vm0, %v1469_v5, 0.0  ;;  %v1471_v14 = vpop.eup %1470 }
 0x417   : > { %1021 = vadd.xlane.f32.xlu1 %v1020_v6  ;;  %v1473_v15 = vpop.eup %1472  ;;  %v638_v21 = vmul.f32 %v1471_v14, %v637_v13 }
 0x418   : > { %v1475_v0 = vpop.eup %1474  ;;  %v451_v18 = vmul.f32 %v1473_v15, %v450_v17 }
 0x419   : > { %v1477_v16 = vpop.eup %1476  ;;  %v829_v26 = vmul.f32 %v1475_v0, %v828_v23 }
 0x41a   : > { %v1019_v30 = vmul.f32 %v1477_v16, %v1018_v28 }
 0x428   : > { %648 = vperm.xlu1 %1461, %v1471_v14  }
 0x429   : > { %461 = vperm.xlu0 %1460, %v1473_v15  }
 0x42c   : > { %839 = vperm.xlu1 %1461, %v1475_v0  }
 0x42d   : > { %1029 = vperm.xlu0 %1460, %v1477_v16  }
 0x444   : > { %v454_v19 = vpop.xlane.xlu1 %453 }
 0x445   : > { %v455_v20 = vadd.f32 %v454_v19, %v451_v18 }
 0x447   : > { %457 = vst.msk [vmem:[#allocation3] sm:$0xff] %vm330_vm2, %v455_v20 }
 0x44e   : > { %v1115_v10 = vld [vmem:[#allocation3] sm:$0xff] }
 0x44f   : > { %1478 = vrcp.f32 %v1115_v10 }
 0x459   : > { %v1479_v12 = vpop.eup %1478 }
 0x45a   : > { %1120 = vperm.xlu1 %1461, %v1479_v12  }
 0x49c   : > { %v641_v22 = vpop.xlane.xlu0 %640 }
 0x49d   : > { %v642_v24 = vadd.f32 %v641_v22, %v638_v21 }
 0x49f   : > { %643 = vst.msk [vmem:[#allocation3 + $0x8] sm:$0xff] %vm330_vm2, %v642_v24 }
 0x4a0   : > { %v832_v27 = vpop.xlane.xlu0 %831 }
 0x4a1   : > { %v833_v29 = vadd.f32 %v832_v27, %v829_v26 }
 0x4a3   : > { %834 = vst.msk [vmem:[#allocation3 + $0x10] sm:$0xff] %vm330_vm2, %v833_v29 }
 0x4a4   : > { %v1022_v31 = vpop.xlane.xlu1 %1021 }
 0x4a5   : > { %v1023_v32 = vadd.f32 %v1022_v31, %v1019_v30 }
 0x4a6   : > { %v1124_v34 = vld [vmem:[#allocation3 + $0x8] sm:$0xff] }
 0x4a7   : > { %1024 = vst.msk [vmem:[#allocation3 + $0x18] sm:$0xff] %vm330_vm2, %v1023_v32  ;;  %1480 = vrcp.f32 %v1124_v34 }
 0x4a8   : > { %v462_v35 = vpop.permute.xlu0 %461  ;;  %v649_v43 = vpop.permute.xlu1 %648 }
 0x4a9   : > { %v464_v36 = vmul.f32 %v462_v35, %v458_v33  ;;  %v651_v45 = vmul.f32 %v649_v43, %v645_v44 }
 0x4aa   : > { %v1133_v37 = vld [vmem:[#allocation3 + $0x10] sm:$0xff] }
 0x4ab   : > { %v538_v38 = vadd.f32 %v1743_v25, %v464_v36  ;;  %1482 = vrcp.f32 %v1133_v37 }
 0x4ac   : > { %v840_v47 = vpop.permute.xlu1 %839  ;;  %v1030_v52 = vpop.permute.xlu0 %1029 }
 0x4ad   : > { %539 = vst.msk [vmem:[#allocation4] sm:$0xff] %vm339_vm0, %v538_v38  ;;  %v842_v25 = vmul.f32 %v840_v47, %v836_v46  ;;  %v1032_v56 = vmul.f32 %v1030_v52, %v1026_v51 }
 0x4ae   : > { %v1142_v39 = vld [vmem:[#allocation3 + $0x18] sm:$0xff] }
 0x4af   : > { %1484 = vrcp.f32 %v1142_v39 }
 0x4b1   : > { %v1481_v40 = vpop.eup %1480 }
 0x4b2   : > { %1129 = vperm.xlu0 %1460, %v1481_v40  }
 0x4b4   : > { %v1117_v7 = vld [vmem:[#allocation4] sm:$0xff] }
 0x4b5   : > { %v1483_v41 = vpop.eup %1482 }
 0x4b6   : > { %1138 = vperm.xlu1 %1461, %v1483_v41  }
 0x4b9   : > { %v1485_v42 = vpop.eup %1484 }
 0x4ba   : > { %1147 = vperm.xlu0 %1460, %v1485_v42  }
 0x4d9   : > { %v1121_v60 = vpop.permute.xlu1 %1120 }
 0x4da   : > { %v1123_v9 = vmul.f32 %v1121_v60, %v1117_v7 }
 0x4e1   : > { %v725_v48 = vpop.f32.mrb[2].mxu0 }
 0x4e2   : > { %v729_v49 = vadd.f32 %v725_v48, %v651_v45  ;;  %v1374_v50 = vpop.f32.mrb[3].mxu0 }
 0x4e4   : > { %730 = vst.msk [vmem:[#allocation4 + $0x8] sm:$0xff] %vm339_vm0, %v729_v49 }
 0x4e5   : > { %v915_v53 = vpop.f32.mrb[4].mxu0 }
 0x4e6   : > { %v919_v54 = vadd.f32 %v915_v53, %v842_v25  ;;  %v1384_v55 = vpop.f32.mrb[5].mxu0 }
 0x4e8   : > { %920 = vst.msk [vmem:[#allocation4 + $0x10] sm:$0xff] %vm339_vm0, %v919_v54 }
 0x4e9   : > { %v1105_v57 = vpop.f32.mrb[6].mxu0 }
 0x4ea   : > { %v1109_v58 = vadd.f32 %v1105_v57, %v1032_v56  ;;  %v1394_v59 = vpop.f32.mrb[7].mxu0 }
 0x4eb   : > { %v1126_v62 = vld [vmem:[#allocation4 + $0x8] sm:$0xff] }
 0x4ec   : > { %1110 = vst.msk [vmem:[#allocation4 + $0x18] sm:$0xff] %vm339_vm0, %v1109_v58 }
 0x4ef   : > { %v1135_v2 = vld [vmem:[#allocation4 + $0x10] sm:$0xff] }
 0x4f3   : > { %v1144_v5 = vld [vmem:[#allocation4 + $0x18] sm:$0xff] }
 0x531   : > { %v1130_v61 = vpop.permute.xlu0 %1129 }
 0x532   : > { %v1132_v63 = vmul.f32 %v1130_v61, %v1126_v62 }
 0x534   : > { %1152 = vrot.lane.b32.xlu1 %v1132_v63, %s1573_s30 }
 0x535   : > { %v1139_v1 = vpop.permute.xlu1 %1138 }
 0x536   : > { %v1141_v3 = vmul.f32 %v1139_v1, %v1135_v2 }
 0x538   : > { %1156 = vrot.lane.b32.xlu0 %v1141_v3, %s1574_s5 }
 0x539   : > { %v1148_v4 = vpop.permute.xlu0 %1147 }
 0x53a   : > { %v1150_v6 = vmul.f32 %v1148_v4, %v1144_v5 }
 0x53c   : > { %1160 = vrot.lane.b32.xlu1 %v1150_v6, %s1575_s6 }
 0x5a6   : > { %v1153_v8 = vpop.permute.xlu1 %1152 }
 0x5a7   : > { %v1163_v14 = vsel %vm339_vm0, %v1123_v9, %v1153_v8 }
 0x5aa   : > { %v1157_v11 = vpop.permute.xlu0 %1156 }
 0x5ab   : > { %v1165_v15 = vsel %vm1164_vm3, %v1163_v14, %v1157_v11 }
 0x5ae   : > { %v1161_v0 = vpop.permute.xlu1 %1160 }
 0x5af   : > { %v1167_v16 = vsel %vm1166_vm4, %v1165_v15, %v1161_v0 }
 0x5b0   : > { %1169 = vst.msk [vmem:[%s295_s10] sm:$0xff] %vm1168_vm5, %v1167_v16 }
 0x5b1   : > { %1499 = shalt.err (!%p1496_p5)
}
 0x5b2   : > { %s1500_s29 = scalar_lea.hbm %s1788_s14, 128  ;;  %s1504_s6 = scalar_lea.hbm %s1839_s4, 256 }
 0x5b3   : > { %p1501_p6 = scmp.ne.s32.totalorder %s1788_s14, %s1500_s29  ;;  %p1505_p10 = scmp.lt.u32.totalorder %s1788_s14, %s1839_s4 }
 0x5b4   : > { %p1506_p11 = scmp.lt.u32.totalorder %s1504_s6, %s1500_s29  ;;  %p1508_p13 = scmp.lt.u32.totalorder %s1500_s29, %s1788_s14 }
 0x5b5   : > { %p1502_p7 = pnand %p1501_p6, %p1642_p4 }
 0x5b6   : > { %p1507_p12 = por %p1506_p11, %p1505_p10 }
 0x5b7   : > { %p1503_p9 = pneg %p1502_p7 }
 0x5b8   : > { %p1509_p0 = por %p1508_p13, %p1507_p12 }
 0x5ba   : > { %p1510_p1 = pnand %p1509_p0, %p1503_p9 }
 0x5bc   : > { %1513 = shalt.err (!%p1510_p1)
}
 0x5bd   : > { %1395 = dma.vmem_to_hbm [thread:$0]  (%p1642_p4), %s1790_s11, 128, %s1788_s14, %s1171_s18  }
 0x5be PF: > { %p1401_p2 = scmp.ge.s32.totalorder %s1564_s20, 2  ;;  %s1198_s9 = sand.u32 1, %s1544_s15  }
 0x5bf   : > { %s1199_s10 = scalar_lea.sflag [#allocation6], %s1198_s9 }
 0x5c0   : > { %p1398_p3 = pnand %p1401_p2, %p1649_p8 }
 0x5c2   : > { %1539 = dma.done.wait (!%p1398_p3), %s1199_s10, 128  }
 0x5c3   : > { %1541 = vsyncadd (!%p1398_p3), %s1199_s10, 4294967168  ;;  %s17_s20 = sadd.s32 1, %s1564_s20   ;;  %s1842_s15 = smov %s1548_s16 }
 0x5c4   : > { %p14_p5 = scmp.ge.s32.totalorder %s17_s20, 4   ;;  %s1843_s16 = smov %s1552_s17 }
 0x5c5   : > { %s1844_s17 = smov %s1655_s28  ;;  %s1845_s18 = smov %s1560_s19 }
 0x5c6   : > { %s1846_s19 = smov %s1848_s23  ;;  %16 = sbr.rel (!%p14_p5) target bundleno = 4 (0x4), region = 99 }
 0x5cd   :  { %1204 = vsyncpa [#allocation6], 1 }
 0x5ce   :  { %1206 = vsyncpa [#allocation6 + $0x1], 1 }

</bundles_post_ra>
